<compile_context>
chip_gen: v5e
topology: v5e:2x2
jax: 0.10.0
libtpu: 0.0.40
codegen_flags: <defaults>
</compile_context>

<pallas_src>
import jax
import jax.numpy as jnp
from jax.experimental import pallas as pl
from jax.experimental.pallas import tpu as pltpu


# ---------------------------------------------------------------------------
# Helpers
# ---------------------------------------------------------------------------
def _round_up(x, m):
    return ((x + m - 1) // m) * m


def _sublane_align(dtype):
    # f32 -> 8, bf16 -> 16 (second-to-last dim tiling).
    itemsize = jnp.dtype(dtype).itemsize
    return 8 * max(1, 4 // itemsize)


def _choose_tile(dim, align, cap):
    """Minimal-padding tile choice.

    Returns (tile, padded_dim) with tile a multiple of `align`, tile <= cap
    (cap floored to an align multiple), padded_dim = tile * num_tiles and
    num_tiles = cdiv(round_up(dim, align), cap).
    """
    cap = max(align, (cap // align) * align)
    padded_min = _round_up(dim, align)
    num = -(-padded_min // cap)
    tile = _round_up(-(-dim // num), align)
    return tile, tile * num


def _pad_to(arr, shape):
    pads = [(0, t - s) for s, t in zip(arr.shape, shape)]
    if all(p == (0, 0) for p in pads):
        return arr
    return jnp.pad(arr, pads)


# ---------------------------------------------------------------------------
# Kernel (shared by both paths): one (tm, tn) output tile, K-accumulated
# directly into the resident f32 output block.
#   x_ref: (tm, tk)  w_ref: (tk, tn)  b_ref: (1, tn)  o_ref: (tm, tn) f32
# ---------------------------------------------------------------------------
def _linear_kernel(x_ref, w_ref, b_ref, o_ref):
    partial = jnp.dot(x_ref[...], w_ref[...], preferred_element_type=jnp.float32)

    @pl.when(pl.program_id(2) == 0)
    def _init():
        o_ref[...] = partial + b_ref[...].astype(jnp.float32)

    @pl.when(pl.program_id(2) > 0)
    def _accum():
        o_ref[...] += partial


# ---------------------------------------------------------------------------
# individual=False path: single Linear shared across variables.
# ---------------------------------------------------------------------------
def prepare_shared_params(weight, bias, *, compute_dtype=jnp.bfloat16,
                          tn_cap=512, tk_cap=1024, tm_cap=1024):
    """One-time (parameter-load-time) cast + pad of Linear(nf, tw) params.
    weight: [nf, tw] (pre-transposed so z @ W), bias: [tw]."""
    nf, tw = weight.shape
    tk, Kp = _choose_tile(nf, 128, tk_cap)
    tn, Np = _choose_tile(tw, 128, tn_cap)
    # v7x megacore: keep >=2 tiles on a parallel axis when it costs no extra
    # padding, so both TensorCores get work even if M fits a single tile.
    if Np // tn == 1 and Np % 256 == 0:
        tn = Np // 2
    w_p = _pad_to(weight.astype(compute_dtype), (Kp, Np))
    b_p = _pad_to(bias.astype(jnp.float32), (Np,)).reshape(1, Np)
    return dict(w=w_p, b=b_p, nf=nf, tw=tw, tk=tk, Kp=Kp, tn=tn, Np=Np,
                tm_cap=tm_cap, compute_dtype=compute_dtype)


def flatten_head_shared(x, params):
    """x: [B, n_vars, d_model, patch_num] -> [B, n_vars, target_window]."""
    B, n_vars, d_model, patch_num = x.shape
    nf = d_model * patch_num
    assert nf == params["nf"], "nf mismatch with prepared parameters"
    tw, tk, Kp, tn, Np = (params[k] for k in ("tw", "tk", "Kp", "tn", "Np"))
    cdt = params["compute_dtype"]

    M = B * n_vars
    sub = _sublane_align(cdt)
    tm, Mp = _choose_tile(M, sub, params["tm_cap"])  # tm covers M when it fits
                                                     # -> W streamed once.

    # Flatten(start_dim=-2) is a pure reshape; cast to the compute dtype
    # (halves activation DMA bytes) and pad to full tiles.
    x_p = _pad_to(x.reshape(M, nf).astype(cdt), (Mp, Kp))

    out = pl.pallas_call(
        _linear_kernel,
        out_shape=jax.ShapeDtypeStruct((Mp, Np), jnp.float32),
        grid_spec=pltpu.PrefetchScalarGridSpec(
            num_scalar_prefetch=0,
            grid=(Mp // tm, Np // tn, Kp // tk),
            in_specs=[
                pl.BlockSpec((tm, tk), lambda i, j, k: (i, k)),   # x tile
                pl.BlockSpec((tk, tn), lambda i, j, k: (k, j)),   # W tile
                pl.BlockSpec((1, tn), lambda i, j, k: (0, j)),    # bias tile
            ],
            out_specs=pl.BlockSpec((tm, tn), lambda i, j, k: (i, j)),
        ),
        compiler_params=pltpu.CompilerParams(
            dimension_semantics=("parallel", "parallel", "arbitrary")
        ),
    )(x_p, params["w"], params["b"])
    return out[:M, :tw].reshape(B, n_vars, tw).astype(x.dtype)


# ---------------------------------------------------------------------------
# individual=True path: one Linear(nf, tw) per variable.
# ---------------------------------------------------------------------------
def prepare_individual_params(weights, biases, *, compute_dtype=jnp.bfloat16,
                              tn_cap=512, tk_cap=1024):
    """weights: [n_vars, nf, tw] (pre-transposed so z @ W), biases: [n_vars, tw]."""
    n_vars, nf, tw = weights.shape
    tk, Kp = _choose_tile(nf, 128, tk_cap)
    tn, Np = _choose_tile(tw, 128, tn_cap)
    w_p = _pad_to(weights.astype(compute_dtype), (n_vars, Kp, Np))
    b_p = _pad_to(biases.astype(jnp.float32), (n_vars, Np)).reshape(n_vars, 1, Np)
    return dict(w=w_p, b=b_p, n_vars=n_vars, nf=nf, tw=tw, tk=tk, Kp=Kp,
                tn=tn, Np=Np, compute_dtype=compute_dtype)


def flatten_head_individual(x, params):
    """x: [B, n_vars, d_model, patch_num] -> [B, n_vars, target_window]."""
    B, n_vars, d_model, patch_num = x.shape
    nf = d_model * patch_num
    assert nf == params["nf"] and n_vars == params["n_vars"]
    tw, tk, Kp, tn, Np = (params[k] for k in ("tw", "tk", "Kp", "tn", "Np"))
    cdt = params["compute_dtype"]

    sub = _sublane_align(cdt)
    Bp = _round_up(B, sub)

    # [n_vars, B, nf]: each variable's activations are a contiguous slab so
    # every per-step x DMA is unstrided and lane-dense; casting to bf16 first
    # halves the transpose traffic.
    # TODO(synk): if the upstream backbone can emit channel-major activations
    # directly, pass them in and drop this transpose (saves an HBM pass).
    x_v = jnp.transpose(x.reshape(B, n_vars, nf).astype(cdt), (1, 0, 2))
    x_p = _pad_to(x_v, (n_vars, Bp, Kp))

    # TODO(synk): pipeline_mode=pl.Buffered(3) on the W spec can further hide
    # DMA latency when Bp is tiny; left at the default pipeline depth here.
    out = pl.pallas_call(
        _linear_kernel,
        out_shape=jax.ShapeDtypeStruct((n_vars, Bp, Np), jnp.float32),
        grid_spec=pltpu.PrefetchScalarGridSpec(
            num_scalar_prefetch=0,
            grid=(n_vars, Np // tn, Kp // tk),
            in_specs=[
                # x slice for variable v, K tile k  -> kernel sees (Bp, tk)
                pl.BlockSpec((None, Bp, tk), lambda v, j, k: (v, 0, k)),
                # W[v] tile (k, j)                  -> kernel sees (tk, tn)
                pl.BlockSpec((None, tk, tn), lambda v, j, k: (v, k, j)),
                # b[v] tile j                       -> kernel sees (1, tn)
                pl.BlockSpec((None, 1, tn), lambda v, j, k: (v, 0, j)),
            ],
            out_specs=pl.BlockSpec((None, Bp, tn), lambda v, j, k: (v, 0, j)),
        ),
        compiler_params=pltpu.CompilerParams(
            dimension_semantics=("parallel", "parallel", "arbitrary")
        ),
    )(x_p, params["w"], params["b"])
    return jnp.transpose(out[:, :B, :tw], (1, 0, 2)).astype(x.dtype)


# ---------------------------------------------------------------------------
# Demo / correctness check
# ---------------------------------------------------------------------------
def _run_case(key, B, n_vars, d_model, patch_num, target_window, **caps):
    nf = d_model * patch_num
    k_x, k_w, k_b, k_w2, k_b2 = jax.random.split(key, 5)
    x = jax.random.normal(k_x, (B, n_vars, d_model, patch_num), dtype=jnp.float32)

    # individual=True parameters: one Linear(nf, target_window) per variable.
    W_ind = jax.random.normal(k_w, (n_vars, nf, target_window), jnp.float32) * 0.05
    b_ind = jax.random.normal(k_b, (n_vars, target_window), jnp.float32) * 0.05
    # individual=False parameters: single Linear(nf, target_window).
    W_sh = jax.random.normal(k_w2, (nf, target_window), jnp.float32) * 0.05
    b_sh = jax.random.normal(k_b2, (target_window,), jnp.float32) * 0.05

    ind_caps = {k: v for k, v in caps.items() if k in ("tn_cap", "tk_cap")}
    p_sh = prepare_shared_params(W_sh, b_sh, **caps)          # one-time prep
    p_ind = prepare_individual_params(W_ind, b_ind, **ind_caps)

    y_sh = jax.block_until_ready(flatten_head_shared(x, p_sh))
    y_ind = jax.block_until_ready(flatten_head_individual(x, p_ind))

    # References with the same bf16 input rounding, f32 accumulation.
    xb = x.reshape(B, n_vars, nf).astype(jnp.bfloat16).astype(jnp.float32)
    ref_sh = xb @ W_sh.astype(jnp.bfloat16).astype(jnp.float32) + b_sh
    ref_ind = (jnp.einsum("bvk,vkn->bvn", xb,
                          W_ind.astype(jnp.bfloat16).astype(jnp.float32))
               + b_ind[None])

    assert y_sh.shape == (B, n_vars, target_window)
    assert y_ind.shape == (B, n_vars, target_window)
    assert jnp.allclose(y_sh, ref_sh, atol=2e-3, rtol=2e-3), "shared mismatch"
    assert jnp.allclose(y_ind, ref_ind, atol=2e-3, rtol=2e-3), "individual mismatch"

    # Sanity vs. full-f32 module semantics (bf16 weight/activation rounding).
    ref_sh32 = x.reshape(B, n_vars, nf) @ W_sh + b_sh
    ref_ind32 = jnp.einsum("bvk,vkn->bvn", x.reshape(B, n_vars, nf), W_ind) + b_ind[None]
    assert jnp.allclose(y_sh, ref_sh32, atol=5e-2, rtol=5e-2), "shared f32 drift"
    assert jnp.allclose(y_ind, ref_ind32, atol=5e-2, rtol=5e-2), "individual f32 drift"


if __name__ == "__main__":
    key = jax.random.PRNGKey(0)
    k1, k2 = jax.random.split(key)

    # Case 1: tiny shapes (nf=32, tw=16) -> exercises the padding wrappers,
    # single-tile grid on every axis.
    _run_case(k1, B=2, n_vars=3, d_model=8, patch_num=4, target_window=16)

    # Case 2: nf=768 with tk_cap=512 (2 K tiles, no padding), tw=512 (N split
    # into 2x256 by the megacore heuristic), M=120 with tm_cap=64 (2 M tiles)
    # -> exercises multi-tile M/N/K accumulation.
    _run_case(k2, B=40, n_vars=3, d_model=48, patch_num=16, target_window=512,
              tm_cap=64, tk_cap=512)

    print("KERNEL_OK")
</pallas_src>

<mosaic_0001>
module attributes {stable_mosaic.version = 11 : i64} {
  func.func @_linear_kernel(%arg0: i32, %arg1: i32, %arg2: i32, %arg3: memref<16x128xbf16, #tpu.memory_space<vmem>>, %arg4: memref<128x128xbf16, #tpu.memory_space<vmem>>, %arg5: memref<1x128xf32, #tpu.memory_space<vmem>>, %arg6: memref<16x128xf32, #tpu.memory_space<vmem>>) attributes {dimension_semantics = [#tpu.dimension_semantics<parallel>, #tpu.dimension_semantics<parallel>, #tpu.dimension_semantics<arbitrary>], iteration_bounds = array<i64: 1, 1, 1>, scalar_prefetch = 0 : i64, scratch_operands = 0 : i64, tpu.core_type = #tpu.core_type<tc>, window_params = [{transform_indices = @transform_0, window_bounds = array<i64: 16, 128>}, {transform_indices = @transform_1, window_bounds = array<i64: 128, 128>}, {transform_indices = @transform_2, window_bounds = array<i64: 1, 128>}, {transform_indices = @transform_3, window_bounds = array<i64: 16, 128>}]} {
    %c0 = arith.constant 0 : index
    %c0_0 = arith.constant 0 : index
    %0 = vector.load %arg3[%c0, %c0_0] : memref<16x128xbf16, #tpu.memory_space<vmem>>, vector<16x128xbf16>
    %c0_1 = arith.constant 0 : index
    %c0_2 = arith.constant 0 : index
    %1 = vector.load %arg4[%c0_1, %c0_2] : memref<128x128xbf16, #tpu.memory_space<vmem>>, vector<128x128xbf16>
    %cst = arith.constant dense<0.000000e+00> : vector<16x128xf32>
    %2 = tpu.matmul %0, %1, %cst {dimension_numbers = #tpu.dot_dimension_numbers<[1], [0], [0], [1], [0, 0, 1, 1], [], []>} : vector<16x128xbf16>, vector<128x128xbf16>, vector<16x128xf32> -> vector<16x128xf32>
    %c0_i32 = arith.constant 0 : i32
    %3 = arith.cmpi eq, %arg2, %c0_i32 : i32
    %4 = arith.extui %3 : i1 to i32
    %c0_i32_3 = arith.constant 0 : i32
    %5 = arith.cmpi ne, %4, %c0_i32_3 : i32
    scf.if %5 {
      %c0_6 = arith.constant 0 : index
      %c0_7 = arith.constant 0 : index
      %9 = vector.load %arg5[%c0_6, %c0_7] : memref<1x128xf32, #tpu.memory_space<vmem>>, vector<1x128xf32>
      %10 = vector.broadcast %9 : vector<1x128xf32> to vector<16x128xf32>
      %11 = arith.addf %2, %10 : vector<16x128xf32>
      %c0_8 = arith.constant 0 : index
      %c0_9 = arith.constant 0 : index
      %12 = vector.load %arg6[%c0_8, %c0_9] : memref<16x128xf32, #tpu.memory_space<vmem>>, vector<16x128xf32>
      tpu.vector_store %arg6[%c0_8, %c0_9], %11 {strides = array<i32>} : memref<16x128xf32, #tpu.memory_space<vmem>>, vector<16x128xf32>,
    } else {
    }
    %c0_i32_4 = arith.constant 0 : i32
    %6 = arith.cmpi sgt, %arg2, %c0_i32_4 : i32
    %7 = arith.extui %6 : i1 to i32
    %c0_i32_5 = arith.constant 0 : i32
    %8 = arith.cmpi ne, %7, %c0_i32_5 : i32
    scf.if %8 {
      %c0_6 = arith.constant 0 : index
      %c0_7 = arith.constant 0 : index
      %9 = vector.load %arg6[%c0_6, %c0_7] : memref<16x128xf32, #tpu.memory_space<vmem>>, vector<16x128xf32>
      %10 = arith.addf %9, %2 : vector<16x128xf32>
      %c0_8 = arith.constant 0 : index
      %c0_9 = arith.constant 0 : index
      %11 = vector.load %arg6[%c0_8, %c0_9] : memref<16x128xf32, #tpu.memory_space<vmem>>, vector<16x128xf32>
      tpu.vector_store %arg6[%c0_8, %c0_9], %10 {strides = array<i32>} : memref<16x128xf32, #tpu.memory_space<vmem>>, vector<16x128xf32>,
    } else {
    }
    return
  }
  func.func @transform_0(%arg0: i32, %arg1: i32, %arg2: i32) -> (i32, i32) {
    %c0_i32 = arith.constant 0 : i32
    return %arg0, %arg2 : i32, i32
  }
  func.func @transform_1(%arg0: i32, %arg1: i32, %arg2: i32) -> (i32, i32) {
    %c0_i32 = arith.constant 0 : i32
    return %arg2, %arg1 : i32, i32
  }
  func.func @transform_2(%arg0: i32, %arg1: i32, %arg2: i32) -> (i32, i32) {
    %c0_i32 = arith.constant 0 : i32
    %c0_i32_0 = arith.constant 0 : i32
    return %c0_i32, %arg1 : i32, i32
  }
  func.func @transform_3(%arg0: i32, %arg1: i32, %arg2: i32) -> (i32, i32) {
    %c0_i32 = arith.constant 0 : i32
    return %arg0, %arg1 : i32, i32
  }
}

</mosaic_0001>

<bundles_post_ra>
// kernel: tpu_custom_call.1
= control target key start
LH: loop header
LB: loop body
LE: loop exit
PB: predicated region body
PF: predicated region fallthrough
CT: control target
= control target key end

     0   :  { %8 = vsyncpa [#allocation3], 0  ;;  %s345_s0 = inlined_call_operand.hbm [shape: bf16[16,128], index: 0, kind: input, shape index: {}]   ;;  %s346_s1 = inlined_call_operand.hbm [shape: bf16[128,128], index: 1, kind: input, shape index: {}]   ;;  %s347_s2 = inlined_call_operand.vmem [shape: f32[1,128], index: 2, kind: input, shape index: {}]   ;;  %s348_s3 = inlined_call_operand.hbm [shape: f32[16,128], index: 3, kind: output, shape index: {}]  }
   0x1   :  { %9 = vsyncpa [#allocation6], 0 }
   0x2   :  { %10 = vsyncpa [#allocation4], 0  ;;  %s15_s14 = sshll.u32 %s345_s0, 4  ;;  %s306_s15 = smov [#allocation2]   ;;  %s16_s14 = int_to_ptr.hbm [resolvable:$true] %s15_s14 }
   0x3   :  { %s17_s16 = sshll.u32 %s306_s15, 4  ;;  %s28_s19 = sshll.u32 %s346_s1, 4  ;;  %s18_s16 = int_to_ptr.vmem [resolvable:$true] %s17_s16  ;;  %s29_s19 = int_to_ptr.hbm [resolvable:$true] %s28_s19 }
   0x4   :  { %s307_s20 = smov 64   ;;  %s308_s21 = smov 4  }
   0x5   :  { %23 = dma.hbm_to_vmem [thread:$0]  %s16_s14, 128, %s18_s16, [#allocation3], %s307_s20, %s307_s20, %s308_s21  }
   0x6   :  { %s309_s22 = smov [#allocation5]  }
   0x7   :  { %s30_s23 = sshll.u32 %s309_s22, 4  ;;  %s31_s23 = int_to_ptr.vmem [resolvable:$true] %s30_s23 }
   0x8   :  { %36 = dma.hbm_to_vmem [thread:$0]  %s29_s19, 1024, %s31_s23, [#allocation6], %s307_s20, %s307_s20, %s308_s21  }
   0x9   :  { %300 = dma.done.wait [#allocation3], 128  }
   0xa   :  { %301 = vsyncadd [#allocation3], 4294967168 }
   0xb   :  { %302 = dma.done.wait [#allocation6], 1024  }
   0xc   :  { %303 = vsyncadd [#allocation6], 4294966272  ;;  %v219_v0 = vld [vmem:[#allocation5 + $0x38] sm:$0xff]  ;;  %v218_v1 = vld [vmem:[#allocation5 + $0x30] sm:$0xff]  ;;  %s310_s24 = smov [#allocation7]   ;;  %s161_s28 = sshll.u32 %s348_s3, 4  ;;  %s162_s28 = int_to_ptr.hbm [resolvable:$true] %s161_s28 }
   0xd   :  { %119 = vmatpush.bf16.msra.mxu0 %v219_v0  ;;  %v217_v2 = vld [vmem:[#allocation5 + $0x28] sm:$0xff]  ;;  %v216_v3 = vld [vmem:[#allocation5 + $0x20] sm:$0xff]  ;;  %v215_v4 = vld [vmem:[#allocation5 + $0x18] sm:$0xff]  ;;  %s159_s25 = sshll.u32 %s310_s24, 4  ;;  %s311_s29 = smov 128   ;;  %s160_s25 = int_to_ptr.vmem [resolvable:$true] %s159_s25 }
   0xe   :  { %v214_v5 = vld [vmem:[#allocation5 + $0x10] sm:$0xff]  ;;  %v213_v6 = vld [vmem:[#allocation5 + $0x8] sm:$0xff]  ;;  %v212_v7 = vld [vmem:[#allocation5] sm:$0xff]  ;;  %s312_s30 = smov 8  }
   0xf   :  { %v211_v8 = vld [vmem:[#allocation2] sm:$0xff] }
  0x10   :  { %v227_v9 = vld [vmem:[%s347_s2] ss:$0 sm:$0xff] }
  0x11   :  { %120 = vmatpush.bf16.msra.mxu0 %v218_v1 }
  0x15   :  { %121 = vmatpush.bf16.msra.mxu0 %v217_v2 }
  0x19   :  { %122 = vmatpush.bf16.msra.mxu0 %v216_v3 }
  0x1d   :  { %123 = vmatpush.bf16.msra.mxu0 %v215_v4 }
  0x21   :  { %124 = vmatpush.bf16.msra.mxu0 %v214_v5 }
  0x25   :  { %125 = vmatpush.bf16.msra.mxu0 %v213_v6 }
  0x29   :  { %126 = vmatpush.bf16.msra.mxu0 %v212_v7 }
  0x2c   :  { %127 = vmatmul.bf16.vlgmr.msra.gmra.mxu0 %v211_v8 }
  0xa9   :  { %v128_v10 = vpop.f32.mrf.mxu0 }
  0xaa   :  { %v141_v11 = vadd.f32 %v227_v9, %v128_v10 }
  0xac   :  { %143 = vst [vmem:[#allocation7] sm:$0xff] %v141_v11 }
  0xb1   :  { %v130_v12 = vpop.f32.mrf.mxu0 }
  0xb2   :  { %v142_v13 = vadd.f32 %v227_v9, %v130_v12 }
  0xb4   :  { %144 = vst [vmem:[#allocation7 + $0x8] sm:$0xff] %v142_v13 }
  0xb5   :  { %167 = dma.vmem_to_hbm [thread:$0]  %s160_s25, 256, %s162_s28, [#allocation4], %s311_s29, %s311_s29, %s312_s30  }
  0xb6   :  { %304 = dma.done.wait [#allocation4], 256  }
  0xb7   :  { %305 = vsyncadd [#allocation4], 4294967040 }
  0xb8   :  { %172 = vsyncpa [#allocation3], 1 }
  0xb9   :  { %173 = vsyncpa [#allocation6], 1 }
  0xba   :  { %174 = vsyncpa [#allocation4], 1 }

</bundles_post_ra>
